<compile_context>
chip_gen: v7x
topology: tpu7x:2x2x1
jax: 0.10.0
libtpu: 0.0.40
codegen_flags: <defaults>
</compile_context>

<pallas_src>
import functools
import math

import jax
import jax.numpy as jnp
import numpy as np
from jax import lax
from jax.experimental import pallas as pl
from jax.experimental.pallas import tpu as pltpu

_LANES = 128
_EPS = 1e-5
_MAX_PACK_WIDTH = 512            # widest packed row (seg matmul ~8*W flop/elem)
_TARGET_TILE_BYTES = 512 * 1024  # ~0.5 MiB input tile ~= 85% of HBM roofline


def _round_up(x, m):
    return ((x + m - 1) // m) * m


def _sublanes_for(dtype):
    # Native sublane packing: 8 rows for 32-bit, 16 for bf16, 32 for int8/fp8.
    return max(8, 32 // max(1, jnp.dtype(dtype).itemsize))


def _plain_kernel(c, x_ref, w_ref, b_ref, o_ref):
    # x_ref: (T, C), one token per row. Lane-dense whenever C % 128 == 0;
    # also the correctness fallback for awkward channel counts.
    x = x_ref[...].astype(jnp.float32)
    inv_c = jnp.float32(1.0 / c)
    mu = jnp.sum(x, axis=-1, keepdims=True) * inv_c
    d = x - mu
    var = jnp.sum(d * d, axis=-1, keepdims=True) * inv_c
    y = d * lax.rsqrt(var + jnp.float32(_EPS))
    o_ref[...] = (y * w_ref[...] + b_ref[...]).astype(o_ref.dtype)


def _packed_kernel(c, baked, x_ref, w_ref, b_ref, seg_ref, o_ref):
    # x_ref: (T, W); each W-lane row packs W//c tokens of c channels.
    # seg_ref: (W, W) bf16 block-diagonal constant (entries 1/c when `baked`,
    # else 1.0). One matmul per statistic does the segmented per-token sum AND
    # broadcasts the result back across each token's lanes, so all loads/stores
    # stay full-lane dense and there are no cross-lane shuffles.
    x = x_ref[...].astype(jnp.float32)
    seg = seg_ref[...]
    # ~f32-grade statistics from bf16 MXU passes: hi/lo split (2 passes per
    # statistic instead of Precision.HIGHEST's 6) keeps the path HBM-bound.
    x_hi = x.astype(jnp.bfloat16)
    x_lo = (x - x_hi.astype(jnp.float32)).astype(jnp.bfloat16)
    mu = (jnp.dot(x_hi, seg, preferred_element_type=jnp.float32)
          + jnp.dot(x_lo, seg, preferred_element_type=jnp.float32))
    if not baked:
        mu = mu * jnp.float32(1.0 / c)
    d = x - mu                       # two-pass form: no E[x^2]-mu^2 cancellation
    q = d * d
    q_hi = q.astype(jnp.bfloat16)
    q_lo = (q - q_hi.astype(jnp.float32)).astype(jnp.bfloat16)
    var = (jnp.dot(q_hi, seg, preferred_element_type=jnp.float32)
           + jnp.dot(q_lo, seg, preferred_element_type=jnp.float32))
    if not baked:
        var = var * jnp.float32(1.0 / c)
    y = d * lax.rsqrt(var + jnp.float32(_EPS))
    o_ref[...] = (y * w_ref[...] + b_ref[...]).astype(o_ref.dtype)


def withbias_layernorm(x, weight, bias, *, tile_rows=None):
    """x: (..., C); weight, bias: (C,). Matches PyTorch WithBias_LayerNorm."""
    orig_shape = x.shape
    C = int(orig_shape[-1])
    rows = 1
    for s in orig_shape[:-1]:
        rows *= int(s)

    x2 = x.reshape(rows, C)
    w32 = weight.astype(jnp.float32).reshape(1, C)
    b32 = bias.astype(jnp.float32).reshape(1, C)
    in_bytes = jnp.dtype(x.dtype).itemsize
    sub = _sublanes_for(x.dtype)

    # ---- layout selection ----------------------------------------------------
    width = C
    packed = False
    P = 1
    if 0 < C < _LANES:
        lcm = (C * _LANES) // math.gcd(C, _LANES)
        if lcm <= _MAX_PACK_WIDTH:
            packed = True
            width = lcm
            P = width // C

    extra_inputs = ()
    extra_specs = []
    if packed:
        rows_pad = _round_up(rows, P)
        if rows_pad != rows:
            # single, tiny pad (< P rows) so the lane-packing reshape is exact
            x2 = jnp.pad(x2, ((0, rows_pad - rows), (0, 0)))
        R = rows_pad // P
        x2 = x2.reshape(R, width)
        w32 = jnp.tile(w32, (1, P))   # lane j -> weight[j % C]
        b32 = jnp.tile(b32, (1, P))
        # Compile-time constant segmented-sum/broadcast matrix; bake 1/C when it
        # is exactly representable in bf16 (powers of two), else scale in f32.
        baked = (C & (C - 1)) == 0
        tok = np.arange(width) // C
        seg_np = (tok[:, None] == tok[None, :]).astype(np.float32)
        if baked:
            seg_np = seg_np / np.float32(C)
        seg = jnp.asarray(seg_np, dtype=jnp.bfloat16)
        extra_inputs = (seg,)
        extra_specs = [pl.BlockSpec((width, width), lambda i: (0, 0))]
        kernel = functools.partial(_packed_kernel, C, baked)
    else:
        R = rows
        kernel = functools.partial(_plain_kernel, C)

    # ---- tile size: small tiles already saturate HBM --------------------------
    if tile_rows is None:
        tile_rows = _TARGET_TILE_BYTES // max(1, width * in_bytes)
    tile_rows = max(1, min(int(tile_rows), 1024))
    if tile_rows >= R:
        tile_rows = R                                   # one block, equals full dim
    else:
        tile_rows = max(sub, (tile_rows // sub) * sub)  # native sublane multiple
    num_tiles = pl.cdiv(R, tile_rows)
    # Ragged last tile handled by Pallas boundary masking: no row padding needed.

    out = pl.pallas_call(
        kernel,
        out_shape=jax.ShapeDtypeStruct((R, width), x.dtype),
        grid=(num_tiles,),
        in_specs=[
            pl.BlockSpec((tile_rows, width), lambda i: (i, 0)),
            pl.BlockSpec((1, width), lambda i: (0, 0)),
            pl.BlockSpec((1, width), lambda i: (0, 0)),
        ] + extra_specs,
        out_specs=pl.BlockSpec((tile_rows, width), lambda i: (i, 0)),
        compiler_params=pltpu.CompilerParams(
            dimension_semantics=("parallel",),
        ),
    )(x2, w32, b32, *extra_inputs)

    if packed:
        out = out.reshape(R * P, C)
    return out[:rows].reshape(orig_shape)


def _reference(x, weight, bias):
    x = x.astype(jnp.float32)
    mu = jnp.mean(x, axis=-1, keepdims=True)
    var = jnp.mean((x - mu) ** 2, axis=-1, keepdims=True)
    return (x - mu) / jnp.sqrt(var + _EPS) * weight + bias


if __name__ == "__main__":
    key = jax.random.PRNGKey(0)
    # Exercises: packed/baked path (C=32), plain lane-dense path (C=128),
    # generalized packed path with a tiny pack-pad (C=48, rows=15),
    # bf16 sublane-16 path, and a multi-tile grid with a ragged last tile.
    cases = [
        ((2, 128, 32), jnp.float32),
        ((2, 8, 128), jnp.float32),
        ((3, 5, 48), jnp.float32),
        ((4, 64, 32), jnp.bfloat16),
        ((2, 33, 128, 32), jnp.float32),
    ]
    for idx, (shape, dtype) in enumerate(cases):
        kx, kw, kb = jax.random.split(jax.random.fold_in(key, idx), 3)
        C = shape[-1]
        x = jax.random.normal(kx, shape, dtype=jnp.float32).astype(dtype)
        weight = 0.5 + jax.random.uniform(kw, (C,), dtype=jnp.float32)
        bias = 0.1 * jax.random.normal(kb, (C,), dtype=jnp.float32)

        y = withbias_layernorm(x, weight, bias)
        y = jax.block_until_ready(y)

        ref = _reference(x, weight, bias)
        assert y.shape == x.shape and y.dtype == x.dtype, (shape, y.shape, y.dtype)
        tol = 5e-2 if dtype == jnp.bfloat16 else 5e-5
        err = float(jnp.max(jnp.abs(y.astype(jnp.float32) - ref)))
        assert jnp.allclose(y.astype(jnp.float32), ref, atol=tol, rtol=tol), (shape, err)

    print("KERNEL_OK")
</pallas_src>

<mosaic_0001>
module attributes {stable_mosaic.version = 11 : i64} {
  func.func @_packed_kernel(%arg0: i32, %arg1: memref<64x128xf32, #tpu.memory_space<vmem>>, %arg2: memref<1x128xf32, #tpu.memory_space<vmem>>, %arg3: memref<1x128xf32, #tpu.memory_space<vmem>>, %arg4: memref<128x128xbf16, #tpu.memory_space<vmem>>, %arg5: memref<64x128xf32, #tpu.memory_space<vmem>>) attributes {dimension_semantics = [#tpu.dimension_semantics<parallel>], iteration_bounds = array<i64: 1>, scalar_prefetch = 0 : i64, scratch_operands = 0 : i64, tpu.core_type = #tpu.core_type<tc>, window_params = [{transform_indices = @transform_0, window_bounds = array<i64: 64, 128>}, {pipeline_mode = #tpu.pipeline_mode<synchronous>, transform_indices = @transform_1, window_bounds = array<i64: 1, 128>}, {pipeline_mode = #tpu.pipeline_mode<synchronous>, transform_indices = @transform_2, window_bounds = array<i64: 1, 128>}, {pipeline_mode = #tpu.pipeline_mode<synchronous>, transform_indices = @transform_3, window_bounds = array<i64: 128, 128>}, {transform_indices = @transform_4, window_bounds = array<i64: 64, 128>}]} {
    %c0 = arith.constant 0 : index
    %c0_0 = arith.constant 0 : index
    %0 = vector.load %arg1[%c0, %c0_0] : memref<64x128xf32, #tpu.memory_space<vmem>>, vector<64x128xf32>
    %c0_1 = arith.constant 0 : index
    %c0_2 = arith.constant 0 : index
    %1 = vector.load %arg4[%c0_1, %c0_2] : memref<128x128xbf16, #tpu.memory_space<vmem>>, vector<128x128xbf16>
    %2 = arith.truncf %0 : vector<64x128xf32> to vector<64x128xbf16>
    %3 = arith.extf %2 : vector<64x128xbf16> to vector<64x128xf32>
    %4 = arith.subf %0, %3 : vector<64x128xf32>
    %5 = arith.truncf %4 : vector<64x128xf32> to vector<64x128xbf16>
    %cst = arith.constant dense<0.000000e+00> : vector<64x128xf32>
    %6 = tpu.matmul %2, %1, %cst {dimension_numbers = #tpu.dot_dimension_numbers<[1], [0], [0], [1], [0, 0, 1, 1], [], []>} : vector<64x128xbf16>, vector<128x128xbf16>, vector<64x128xf32> -> vector<64x128xf32>
    %cst_3 = arith.constant dense<0.000000e+00> : vector<64x128xf32>
    %7 = tpu.matmul %5, %1, %cst_3 {dimension_numbers = #tpu.dot_dimension_numbers<[1], [0], [0], [1], [0, 0, 1, 1], [], []>} : vector<64x128xbf16>, vector<128x128xbf16>, vector<64x128xf32> -> vector<64x128xf32>
    %8 = arith.addf %6, %7 : vector<64x128xf32>
    %9 = arith.subf %0, %8 : vector<64x128xf32>
    %10 = arith.mulf %9, %9 : vector<64x128xf32>
    %11 = arith.truncf %10 : vector<64x128xf32> to vector<64x128xbf16>
    %12 = arith.extf %11 : vector<64x128xbf16> to vector<64x128xf32>
    %13 = arith.subf %10, %12 : vector<64x128xf32>
    %14 = arith.truncf %13 : vector<64x128xf32> to vector<64x128xbf16>
    %cst_4 = arith.constant dense<0.000000e+00> : vector<64x128xf32>
    %15 = tpu.matmul %11, %1, %cst_4 {dimension_numbers = #tpu.dot_dimension_numbers<[1], [0], [0], [1], [0, 0, 1, 1], [], []>} : vector<64x128xbf16>, vector<128x128xbf16>, vector<64x128xf32> -> vector<64x128xf32>
    %cst_5 = arith.constant dense<0.000000e+00> : vector<64x128xf32>
    %16 = tpu.matmul %14, %1, %cst_5 {dimension_numbers = #tpu.dot_dimension_numbers<[1], [0], [0], [1], [0, 0, 1, 1], [], []>} : vector<64x128xbf16>, vector<128x128xbf16>, vector<64x128xf32> -> vector<64x128xf32>
    %17 = arith.addf %15, %16 : vector<64x128xf32>
    %cst_6 = arith.constant 9.99999974E-6 : f32
    %18 = vector.broadcast %cst_6 : f32 to vector<64x128xf32>
    %19 = arith.addf %17, %18 : vector<64x128xf32>
    %20 = math.rsqrt %19 : vector<64x128xf32>
    %21 = arith.mulf %9, %20 : vector<64x128xf32>
    %c0_7 = arith.constant 0 : index
    %c0_8 = arith.constant 0 : index
    %22 = vector.load %arg2[%c0_7, %c0_8] : memref<1x128xf32, #tpu.memory_space<vmem>>, vector<1x128xf32>
    %23 = vector.broadcast %22 : vector<1x128xf32> to vector<64x128xf32>
    %24 = arith.mulf %21, %23 : vector<64x128xf32>
    %c0_9 = arith.constant 0 : index
    %c0_10 = arith.constant 0 : index
    %25 = vector.load %arg3[%c0_9, %c0_10] : memref<1x128xf32, #tpu.memory_space<vmem>>, vector<1x128xf32>
    %26 = vector.broadcast %25 : vector<1x128xf32> to vector<64x128xf32>
    %27 = arith.addf %24, %26 : vector<64x128xf32>
    %c0_11 = arith.constant 0 : index
    %c0_12 = arith.constant 0 : index
    %28 = vector.load %arg5[%c0_11, %c0_12] : memref<64x128xf32, #tpu.memory_space<vmem>>, vector<64x128xf32>
    tpu.vector_store %arg5[%c0_11, %c0_12], %27 {strides = array<i32>} : memref<64x128xf32, #tpu.memory_space<vmem>>, vector<64x128xf32>,
    return
  }
  func.func @transform_0(%arg0: i32) -> (i32, i32) {
    %c0_i32 = arith.constant 0 : i32
    %c0_i32_0 = arith.constant 0 : i32
    return %arg0, %c0_i32 : i32, i32
  }
  func.func @transform_1(%arg0: i32) -> (i32, i32) {
    %c0_i32 = arith.constant 0 : i32
    %c0_i32_0 = arith.constant 0 : i32
    %c0_i32_1 = arith.constant 0 : i32
    return %c0_i32, %c0_i32_0 : i32, i32
  }
  func.func @transform_2(%arg0: i32) -> (i32, i32) {
    %c0_i32 = arith.constant 0 : i32
    %c0_i32_0 = arith.constant 0 : i32
    %c0_i32_1 = arith.constant 0 : i32
    return %c0_i32, %c0_i32_0 : i32, i32
  }
  func.func @transform_3(%arg0: i32) -> (i32, i32) {
    %c0_i32 = arith.constant 0 : i32
    %c0_i32_0 = arith.constant 0 : i32
    %c0_i32_1 = arith.constant 0 : i32
    return %c0_i32, %c0_i32_0 : i32, i32
  }
  func.func @transform_4(%arg0: i32) -> (i32, i32) {
    %c0_i32 = arith.constant 0 : i32
    %c0_i32_0 = arith.constant 0 : i32
    return %arg0, %c0_i32 : i32, i32
  }
}

</mosaic_0001>

<bundles_post_ra>
// kernel: tpu_custom_call.1
= control target key start
LH: loop header
LB: loop body
LE: loop exit
PB: predicated region body
PF: predicated region fallthrough
CT: control target
= control target key end

     0   :  { %9 = vsyncpa [#allocation3], 0  ;;  %s1041_s0 = inlined_call_operand.hbm [shape: f32[64,128], index: 0, kind: input, shape index: {}]   ;;  %s1042_s1 = inlined_call_operand.vmem [shape: f32[1,128], index: 1, kind: input, shape index: {}]   ;;  %s1043_s2 = inlined_call_operand.vmem [shape: f32[1,128], index: 2, kind: input, shape index: {}]   ;;  %s1044_s3 = inlined_call_operand.hbm [shape: bf16[128,128], index: 3, kind: input, shape index: {}]   ;;  %s1045_s4 = inlined_call_operand.hbm [shape: f32[64,128], index: 4, kind: output, shape index: {}]  }
   0x1   :  { %10 = vsyncpa [#allocation6], 0 }
   0x2   :  { %11 = vsyncpa [#allocation4], 0  ;;  %s796_s15 = smov [#allocation2]   ;;  %s724_s19 = scalar_lea.hbm %s1041_s0, 1024 }
   0x3   :  { %s17_s16 = sshll.u32 %s796_s15, 4  ;;  %p725_p0 = scmp.ne.s32.totalorder %s1041_s0, %s724_s19  ;;  %s18_s16 = int_to_ptr.vmem [resolvable:$true] %s17_s16 }
   0x4   :  { %p728_p1 = scmp.lt.u32.totalorder %s724_s19, %s1041_s0 }
   0x6   :  { %p730_p2 = pnand %p728_p1, %p725_p0 }
   0x8   :  { %733 = shalt.err (!%p730_p2)
}
   0x9   :  { %s734_s24 = scalar_lea.vmem %s18_s16, 1024  ;;  %p739_p4 = scmp.lt.s32.totalorder %s18_s16, %s18_s16 }
   0xa   :  { %p735_p3 = scmp.ne.s32.totalorder %s18_s16, %s734_s24  ;;  %p740_p5 = scmp.lt.s32.totalorder %s734_s24, %s734_s24 }
   0xc   :  { %p741_p6 = por %p740_p5, %p739_p4 }
   0xe   :  { %p742_p7 = pnand %p741_p6, %p735_p3 }
  0x10   :  { %745 = shalt.err (!%p742_p7)
}
  0x11   :  { %s797_s25 = smov 128   ;;  %s798_s26 = smov 8  }
  0x12   :  { %23 = dma.hbm_to_vmem [thread:$0]  %s1041_s0, 1024, %s18_s16, [#allocation3], %s797_s25, %s797_s25, %s798_s26  }
  0x13   :  { %s799_s29 = smov [#allocation5]   ;;  %s746_s7 = scalar_lea.hbm %s1044_s3, 1024 }
  0x14   :  { %s33_s30 = sshll.u32 %s799_s29, 4  ;;  %p747_p8 = scmp.ne.s32.totalorder %s1044_s3, %s746_s7  ;;  %s34_s30 = int_to_ptr.vmem [resolvable:$true] %s33_s30 }
  0x15   :  { %p750_p9 = scmp.lt.u32.totalorder %s746_s7, %s1044_s3 }
  0x17   :  { %p752_p10 = pnand %p750_p9, %p747_p8 }
  0x19   :  { %755 = shalt.err (!%p752_p10)
}
  0x1a   :  { %s756_s12 = scalar_lea.vmem %s34_s30, 1024  ;;  %p761_p12 = scmp.lt.s32.totalorder %s34_s30, %s34_s30 }
  0x1b   :  { %p757_p11 = scmp.ne.s32.totalorder %s34_s30, %s756_s12  ;;  %p762_p13 = scmp.lt.s32.totalorder %s756_s12, %s756_s12 }
  0x1d   :  { %p763_p0 = por %p762_p13, %p761_p12 }
  0x1f   :  { %p764_p1 = pnand %p763_p0, %p757_p11 }
  0x21   :  { %767 = shalt.err (!%p764_p1)
}
  0x22   :  { %s800_s0 = smov 64   ;;  %s801_s13 = smov 4  }
  0x23   :  { %39 = dma.hbm_to_vmem [thread:$0]  %s1044_s3, 1024, %s34_s30, [#allocation6], %s800_s0, %s800_s0, %s801_s13  }
  0x24   :  { %790 = dma.done.wait [#allocation3], 1024  }
  0x25   :  { %791 = vsyncadd [#allocation3], 4294966272 }
  0x26   :  { %792 = dma.done.wait [#allocation6], 1024  }
  0x27   :  { %793 = vsyncadd [#allocation6], 4294966272  ;;  %v855_v0 = vld [vmem:[#allocation5] sm:$0xff]   ;;  %v857_v1 = vld [vmem:[#allocation5 + $0x8] sm:$0xff]  }
  0x28   :  { %581 = vmatprep.subr.bf16.mxu0 %v855_v0  ;;  %629 = vmatprep.subr.bf16.mxu1 %v855_v0  ;;  %v864_v2 = vld [vmem:[#allocation5 + $0x10] sm:$0xff]   ;;  %v870_v3 = vld [vmem:[#allocation5 + $0x18] sm:$0xff]   ;;  %v872_v4 = vld [vmem:[#allocation2] sm:$0xff] }
  0x29   :  { %582 = vmatpush3.bf16.msra.mxu0 %v855_v0  ;;  %630 = vmatpush3.bf16.msra.mxu1 %v855_v0  ;;  %v874_v5 = vld [vmem:[#allocation2 + $0x8] sm:$0xff]  ;;  %v886_v9 = vld [vmem:[#allocation5 + $0x20] sm:$0xff]   ;;  %v892_v13 = vld [vmem:[#allocation2 + $0x10] sm:$0xff] }
  0x2a   :  { %583 = vmatprep.subr.bf16.mxu0 %v857_v1  ;;  %631 = vmatprep.subr.bf16.mxu1 %v857_v1  ;;  %v879_v6 = vpack.c.bf16 %v874_v5, %v872_v4  ;;  %v894_v14 = vld [vmem:[#allocation2 + $0x18] sm:$0xff]  ;;  %v898_v15 = vld [vmem:[#allocation5 + $0x28] sm:$0xff]   ;;  %v900_v16 = vld [vmem:[#allocation2 + $0x20] sm:$0xff] }
  0x2b   :  { %v902_v17 = vld [vmem:[#allocation2 + $0x28] sm:$0xff]  ;;  %v72_v18 = vpack.c.bf16 %v894_v14, %v892_v13  ;;  %v912_v20 = vld [vmem:[#allocation5 + $0x30] sm:$0xff]   ;;  %v918_v26 = vld [vmem:[#allocation2 + $0x38] sm:$0xff] }
  0x2c   :  { %v75_v7 = vunpack.c.l.bf16 %v879_v6  ;;  %v76_v8 = vunpack.c.h.bf16 %v879_v6  ;;  %v73_v19 = vpack.c.bf16 %v902_v17, %v900_v16  ;;  %v916_v25 = vld [vmem:[#allocation2 + $0x30] sm:$0xff]  ;;  %v922_v27 = vld [vmem:[#allocation5 + $0x38] sm:$0xff]  }
  0x2d   :  { %584 = vmatpush3.bf16.msra.mxu0 %v857_v1  ;;  %632 = vmatpush3.bf16.msra.mxu1 %v857_v1  ;;  %v77_v21 = vunpack.c.l.bf16 %v72_v18  ;;  %v78_v22 = vunpack.c.h.bf16 %v72_v18  ;;  %v74_v30 = vpack.c.bf16 %v918_v26, %v916_v25 }
  0x2e   :  { %585 = vmatprep.subr.bf16.mxu0 %v864_v2  ;;  %633 = vmatprep.subr.bf16.mxu1 %v864_v2  ;;  %v83_v10 = vsub.f32 %v872_v4, %v75_v7  ;;  %v84_v11 = vsub.f32 %v874_v5, %v76_v8  ;;  %v79_v23 = vunpack.c.l.bf16 %v73_v19  ;;  %v80_v24 = vunpack.c.h.bf16 %v73_v19 }
  0x2f   :  { %v85_v28 = vsub.f32 %v892_v13, %v77_v21  ;;  %v86_v29 = vsub.f32 %v894_v14, %v78_v22  ;;  %v81_v34 = vunpack.c.l.bf16 %v74_v30  ;;  %v82_v35 = vunpack.c.h.bf16 %v74_v30 }
  0x30   :  { %v91_v12 = vpack.c.bf16 %v84_v11, %v83_v10  ;;  %v87_v31 = vsub.f32 %v900_v16, %v79_v23  ;;  %v88_v32 = vsub.f32 %v902_v17, %v80_v24 }
  0x31   :  { %586 = vmatpush3.bf16.msra.mxu0 %v864_v2  ;;  %634 = vmatpush3.bf16.msra.mxu1 %v864_v2  ;;  %v92_v33 = vpack.c.bf16 %v86_v29, %v85_v28  ;;  %v89_v37 = vsub.f32 %v916_v25, %v81_v34  ;;  %v90_v38 = vsub.f32 %v918_v26, %v82_v35 }
  0x32   :  { %587 = vmatprep.subr.bf16.mxu0 %v870_v3  ;;  %635 = vmatprep.subr.bf16.mxu1 %v870_v3  ;;  %v93_v36 = vpack.c.bf16 %v88_v32, %v87_v31 }
  0x33   :  { %597 = vmatprep.mubr.bf16.mxu0 %v91_v12  ;;  %v94_v39 = vpack.c.bf16 %v90_v38, %v89_v37 }
  0x35   :  { %588 = vmatpush3.bf16.msra.mxu0 %v870_v3  ;;  %636 = vmatpush3.bf16.msra.mxu1 %v870_v3 }
  0x36   :  { %589 = vmatprep.subr.bf16.mxu0 %v886_v9  ;;  %637 = vmatprep.subr.bf16.mxu1 %v886_v9 }
  0x39   :  { %590 = vmatpush3.bf16.msra.mxu0 %v886_v9  ;;  %638 = vmatpush3.bf16.msra.mxu1 %v886_v9 }
  0x3a   :  { %591 = vmatprep.subr.bf16.mxu0 %v898_v15  ;;  %639 = vmatprep.subr.bf16.mxu1 %v898_v15 }
  0x3d   :  { %592 = vmatpush3.bf16.msra.mxu0 %v898_v15  ;;  %640 = vmatpush3.bf16.msra.mxu1 %v898_v15 }
  0x3e   :  { %593 = vmatprep.subr.bf16.mxu0 %v912_v20  ;;  %641 = vmatprep.subr.bf16.mxu1 %v912_v20 }
  0x41   :  { %594 = vmatpush3.bf16.msra.mxu0 %v912_v20  ;;  %642 = vmatpush3.bf16.msra.mxu1 %v912_v20 }
  0x42   :  { %595 = vmatprep.subr.bf16.mxu0 %v922_v27  ;;  %643 = vmatprep.subr.bf16.mxu1 %v922_v27 }
  0x45   :  { %596 = vmatpush3.bf16.msra.mxu0 %v922_v27  ;;  %644 = vmatpush3.bf16.msra.mxu1 %v922_v27 }
  0x46   :  { %605 = vmatprep.subr.bf16.mxu0 %v855_v0  ;;  %653 = vmatprep.subr.bf16.mxu1 %v855_v0 }
  0x48   :  { %598 = vmatmul.mubr.bf16.vlgmr.msra.gmra.mrb[0].mxu0 %v92_v33 }
  0x49   :  { %606 = vmatpush3.bf16.msra.mxu0 %v855_v0  ;;  %601 = vmatprep.mubr.bf16.mxu0 %v93_v36 }
  0x4a   :  { %607 = vmatprep.subr.bf16.mxu0 %v857_v1 }
  0x4d   :  { %608 = vmatpush3.bf16.msra.mxu0 %v857_v1 }
  0x4e   :  { %609 = vmatprep.subr.bf16.mxu0 %v864_v2 }
  0x50   :  { %602 = vmatmul.mubr.bf16.gmra.mrb[4].mxu0 %v94_v39 }
  0x51   :  { %610 = vmatpush3.bf16.msra.mxu0 %v864_v2  ;;  %621 = vmatprep.mubr.bf16.mxu0 %v879_v6 }
  0x52   :  { %611 = vmatprep.subr.bf16.mxu0 %v870_v3 }
  0x55   :  { %612 = vmatpush3.bf16.msra.mxu0 %v870_v3 }
  0x56   :  { %613 = vmatprep.subr.bf16.mxu0 %v886_v9 }
  0x59   :  { %614 = vmatpush3.bf16.msra.mxu0 %v886_v9 }
  0x5a   :  { %615 = vmatprep.subr.bf16.mxu0 %v898_v15 }
  0x5d   :  { %616 = vmatpush3.bf16.msra.mxu0 %v898_v15 }
  0x5e   :  { %617 = vmatprep.subr.bf16.mxu0 %v912_v20 }
  0x61   :  { %618 = vmatpush3.bf16.msra.mxu0 %v912_v20 }
  0x62   :  { %619 = vmatprep.subr.bf16.mxu0 %v922_v27 }
  0x65   :  { %620 = vmatpush3.bf16.msra.mxu0 %v922_v27 }
  0x68   :  { %622 = vmatmul.mubr.bf16.vlgmr.msra.gmra.mrb[0].mxu0 %v72_v18 }
  0x69   :  { %625 = vmatprep.mubr.bf16.mxu0 %v73_v19 }
  0x70   :  { %626 = vmatmul.mubr.bf16.gmra.mrb[4].mxu0 %v74_v30 }
 0x13b   :  { %v623_v40 = vpop.f32.mrb[0].mxu0 }
 0x13c   :  { %v958_v41 = vsub.f32 %v892_v13, %v623_v40  ;;  %v242_v42 = vpop.f32.mrb[1].mxu0 }
 0x13d   :  { %v961_v43 = vsub.f32 %v872_v4, %v242_v42  ;;  %v624_v44 = vpop.f32.mrb[2].mxu0  ;;  %v531_v42 = vld [vmem:[%s1042_s1] ss:$0 sm:$0xff]  ;;  %s802_s1 = smov [#allocation7]  }
 0x13e   :  { %v964_v45 = vsub.f32 %v894_v14, %v624_v44  ;;  %v245_v46 = vpop.f32.mrb[3].mxu0  ;;  %v283_v48 = vmul.f32 %v958_v41, %v958_v41 }
 0x13f   :  { %v967_v47 = vsub.f32 %v874_v5, %v245_v46  ;;  %v281_v50 = vmul.f32 %v961_v43, %v961_v43 }
 0x140   :  { %v284_v49 = vmul.f32 %v964_v45, %v964_v45 }
 0x141   :  { %v282_v51 = vmul.f32 %v967_v47, %v967_v47 }
 0x142   :  { %v290_v52 = vpack.c.bf16 %v284_v49, %v283_v48 }
 0x143   :  { %v289_v53 = vpack.c.bf16 %v282_v51, %v281_v50  ;;  %v627_v54 = vpop.f32.mrb[4].mxu0 }
 0x144   :  { %v296_v55 = vunpack.c.h.bf16 %v290_v52  ;;  %v978_v56 = vsub.f32 %v916_v25, %v627_v54  ;;  %v258_v57 = vpop.f32.mrb[5].mxu0  ;;  %v295_v58 = vunpack.c.l.bf16 %v290_v52 }
 0x145   :  { %v981_v59 = vsub.f32 %v900_v16, %v258_v57  ;;  %v628_v60 = vpop.f32.mrb[6].mxu0  ;;  %v293_v61 = vunpack.c.l.bf16 %v289_v53  ;;  %v294_v62 = vunpack.c.h.bf16 %v289_v53 }
 0x146   :  { %v304_v63 = vsub.f32 %v284_v49, %v296_v55  ;;  %v984_v4 = vsub.f32 %v918_v26, %v628_v60  ;;  %v261_v5 = vpop.f32.mrb[7].mxu0  ;;  %v303_v6 = vsub.f32 %v283_v48, %v295_v58  ;;  %v287_v11 = vmul.f32 %v978_v56, %v978_v56  ;;  %v532_v49 = vld [vmem:[%s1043_s2] ss:$0 sm:$0xff]  ;;  %s510_s2 = sshll.u32 %s802_s1, 4  ;;  %s511_s2 = int_to_ptr.vmem [resolvable:$true] %s510_s2 }
 0x147   :  { %v987_v7 = vsub.f32 %v902_v17, %v261_v5  ;;  %v301_v8 = vsub.f32 %v281_v50, %v293_v61  ;;  %v302_v10 = vsub.f32 %v282_v51, %v294_v62  ;;  %v285_v13 = vmul.f32 %v981_v59, %v981_v59  ;;  %s768_s19 = scalar_lea.vmem %s511_s2, 1024  ;;  %p773_p3 = scmp.lt.s32.totalorder %s511_s2, %s511_s2 }
 0x148   :  { %v288_v12 = vmul.f32 %v984_v4, %v984_v4  ;;  %v310_v19 = vpack.c.bf16 %v304_v63, %v303_v6  ;;  %p769_p2 = scmp.ne.s32.totalorder %s511_s2, %s768_s19  ;;  %p774_p4 = scmp.lt.s32.totalorder %s768_s19, %s768_s19 }
 0x149   :  { %v286_v14 = vmul.f32 %v987_v7, %v987_v7  ;;  %v309_v16 = vpack.c.bf16 %v302_v10, %v301_v8 }
 0x14a   :  { %v292_v18 = vpack.c.bf16 %v288_v12, %v287_v11  ;;  %p775_p5 = por %p774_p4, %p773_p3 }
 0x14b   :  { %v291_v21 = vpack.c.bf16 %v286_v14, %v285_v13  ;;  %645 = vmatprep.mubr.bf16.mxu1 %v309_v16 }
 0x14c   :  { %v300_v17 = vunpack.c.h.bf16 %v292_v18  ;;  %646 = vmatmul.mubr.bf16.vlgmr.msra.gmra.mrb[0].mxu1 %v310_v19  ;;  %v299_v22 = vunpack.c.l.bf16 %v292_v18  ;;  %p776_p6 = pnand %p775_p5, %p769_p2 }
 0x14d   :  { %v298_v23 = vunpack.c.h.bf16 %v291_v21  ;;  %654 = vmatpush3.bf16.msra.mxu1 %v855_v0  ;;  %v297_v24 = vunpack.c.l.bf16 %v291_v21 }
 0x14e   :  { %v308_v25 = vsub.f32 %v288_v12, %v300_v17  ;;  %655 = vmatprep.subr.bf16.mxu1 %v857_v1  ;;  %v307_v26 = vsub.f32 %v287_v11, %v299_v22 }
 0x14f   :  { %v306_v28 = vsub.f32 %v286_v14, %v298_v23  ;;  %v305_v29 = vsub.f32 %v285_v13, %v297_v24 }
 0x150   :  { %v312_v31 = vpack.c.bf16 %v308_v25, %v307_v26 }
 0x151   :  { %656 = vmatpush3.bf16.msra.mxu1 %v857_v1  ;;  %v311_v30 = vpack.c.bf16 %v306_v28, %v305_v29 }
 0x152   :  { %657 = vmatprep.subr.bf16.mxu1 %v864_v2 }
 0x153   :  { %649 = vmatprep.mubr.bf16.mxu1 %v311_v30 }
 0x154   :  { %650 = vmatmul.mubr.bf16.gmra.mrb[4].mxu1 %v312_v31 }
 0x155   :  { %658 = vmatpush3.bf16.msra.mxu1 %v864_v2  ;;  %669 = vmatprep.mubr.bf16.mxu1 %v289_v53 }
 0x156   :  { %659 = vmatprep.subr.bf16.mxu1 %v870_v3 }
 0x159   :  { %660 = vmatpush3.bf16.msra.mxu1 %v870_v3 }
 0x15a   :  { %661 = vmatprep.subr.bf16.mxu1 %v886_v9 }
 0x15d   :  { %662 = vmatpush3.bf16.msra.mxu1 %v886_v9 }
 0x15e   :  { %663 = vmatprep.subr.bf16.mxu1 %v898_v15 }
 0x161   :  { %664 = vmatpush3.bf16.msra.mxu1 %v898_v15 }
 0x162   :  { %665 = vmatprep.subr.bf16.mxu1 %v912_v20 }
 0x165   :  { %666 = vmatpush3.bf16.msra.mxu1 %v912_v20 }
 0x166   :  { %667 = vmatprep.subr.bf16.mxu1 %v922_v27 }
 0x169   :  { %668 = vmatpush3.bf16.msra.mxu1 %v922_v27 }
 0x16c   :  { %670 = vmatmul.mubr.bf16.vlgmr.msra.gmra.mrb[0].mxu1 %v290_v52 }
 0x16d   :  { %673 = vmatprep.mubr.bf16.mxu1 %v291_v21 }
 0x174   :  { %674 = vmatmul.mubr.bf16.gmra.mrb[4].mxu1 %v292_v18 }
 0x23f   :  { %v671_v0 = vpop.f32.mrb[0].mxu1 }
 0x240   :  { %v445_v1 = vadd.f32 1e-05, %v671_v0  ;;  %v412_v2 = vpop.f32.mrb[1].mxu1 }
 0x241   :  { %v443_v3 = vadd.f32 1e-05, %v412_v2  ;;  %v672_v9 = vpop.f32.mrb[2].mxu1 }
 0x242   :  { %708 = vrsqrt.f32 %v445_v1  ;;  %v446_v32 = vadd.f32 1e-05, %v672_v9  ;;  %v415_v33 = vpop.f32.mrb[3].mxu1 }
 0x243   :  { %710 = vrsqrt.f32 %v443_v3  ;;  %v444_v15 = vadd.f32 1e-05, %v415_v33 }
 0x244   :  { %712 = vrsqrt.f32 %v446_v32 }
 0x245   :  { %714 = vrsqrt.f32 %v444_v15 }
 0x247   :  { %v675_v20 = vpop.f32.mrb[4].mxu1 }
 0x248   :  { %v449_v34 = vadd.f32 1e-05, %v675_v20  ;;  %v428_v35 = vpop.f32.mrb[5].mxu1 }
 0x249   :  { %v447_v36 = vadd.f32 1e-05, %v428_v35  ;;  %v676_v27 = vpop.f32.mrb[6].mxu1 }
 0x24a   :  { %716 = vrsqrt.f32 %v449_v34  ;;  %v450_v37 = vadd.f32 1e-05, %v676_v27  ;;  %v431_v38 = vpop.f32.mrb[7].mxu1 }
 0x24b   :  { %718 = vrsqrt.f32 %v447_v36  ;;  %v448_v39 = vadd.f32 1e-05, %v431_v38 }
 0x24c   :  { %v709_v40 = vpop.eup %708  ;;  %720 = vrsqrt.f32 %v450_v37 }
 0x24d   :  { %v711_v44 = vpop.eup %710  ;;  %v461_v46 = vmul.f32 %v709_v40, %v958_v41  ;;  %722 = vrsqrt.f32 %v448_v39 }
 0x24e   :  { %v713_v48 = vpop.eup %712  ;;  %v459_v50 = vmul.f32 %v711_v44, %v961_v43 }
 0x24f   :  { %v715_v51 = vpop.eup %714  ;;  %v476_v52 = vmul.f32 %v531_v42, %v461_v46  ;;  %v462_v53 = vmul.f32 %v713_v48, %v964_v45 }
 0x250   :  { %v474_v54 = vmul.f32 %v531_v42, %v459_v50  ;;  %v460_v55 = vmul.f32 %v715_v51, %v967_v47 }
 0x251   :  { %v491_v57 = vadd.f32 %v532_v49, %v476_v52  ;;  %v477_v58 = vmul.f32 %v531_v42, %v462_v53 }
 0x252   :  { %v489_v60 = vadd.f32 %v532_v49, %v474_v54  ;;  %v475_v61 = vmul.f32 %v531_v42, %v460_v55 }
 0x253   :  { %499 = vst [vmem:[#allocation7 + $0x10] sm:$0xff] %v491_v57  ;;  %v492_v41 = vadd.f32 %v532_v49, %v477_v58 }
 0x254   :  { %v717_v62 = vpop.eup %716  ;;  %497 = vst [vmem:[#allocation7] sm:$0xff] %v489_v60  ;;  %v490_v63 = vadd.f32 %v532_v49, %v475_v61 }
 0x255   :  { %v719_v5 = vpop.eup %718  ;;  %500 = vst [vmem:[#allocation7 + $0x18] sm:$0xff] %v492_v41  ;;  %v465_v43 = vmul.f32 %v717_v62, %v978_v56 }
 0x256   :  { %v721_v6 = vpop.eup %720  ;;  %498 = vst [vmem:[#allocation7 + $0x8] sm:$0xff] %v490_v63  ;;  %v463_v45 = vmul.f32 %v719_v5, %v981_v59 }
 0x257   :  { %v723_v8 = vpop.eup %722  ;;  %v480_v10 = vmul.f32 %v531_v42, %v465_v43  ;;  %v466_v47 = vmul.f32 %v721_v6, %v984_v4 }
 0x258   :  { %v478_v11 = vmul.f32 %v531_v42, %v463_v45  ;;  %v464_v12 = vmul.f32 %v723_v8, %v987_v7 }
 0x259   :  { %v495_v13 = vadd.f32 %v532_v49, %v480_v10  ;;  %v481_v14 = vmul.f32 %v531_v42, %v466_v47 }
 0x25a   :  { %v493_v16 = vadd.f32 %v532_v49, %v478_v11  ;;  %v479_v18 = vmul.f32 %v531_v42, %v464_v12 }
 0x25b   :  { %503 = vst [vmem:[#allocation7 + $0x30] sm:$0xff] %v495_v13  ;;  %v496_v19 = vadd.f32 %v532_v49, %v481_v14 }
 0x25c   :  { %501 = vst [vmem:[#allocation7 + $0x20] sm:$0xff] %v493_v16  ;;  %v494_v56 = vadd.f32 %v532_v49, %v479_v18 }
 0x25d   :  { %504 = vst [vmem:[#allocation7 + $0x38] sm:$0xff] %v496_v19 }
 0x25e   :  { %502 = vst [vmem:[#allocation7 + $0x28] sm:$0xff] %v494_v56 }
 0x25f   :  { %779 = shalt.err (!%p776_p6)
}
 0x260   :  { %s780_s22 = scalar_lea.hbm %s1045_s4, 1024 }
 0x261   :  { %p781_p7 = scmp.ne.s32.totalorder %s1045_s4, %s780_s22  ;;  %p784_p8 = scmp.lt.u32.totalorder %s780_s22, %s1045_s4 }
 0x263   :  { %p786_p9 = pnand %p784_p8, %p781_p7 }
 0x265   :  { %789 = shalt.err (!%p786_p9)
}
 0x266   :  { %516 = dma.vmem_to_hbm [thread:$0]  %s511_s2, 1024, %s1045_s4, [#allocation4], %s797_s25, %s797_s25, %s798_s26  }
 0x267   :  { %794 = dma.done.wait [#allocation4], 1024  }
 0x268   :  { %795 = vsyncadd [#allocation4], 4294966272 }
 0x269   :  { %520 = vsyncpa [#allocation3], 1 }
 0x26a   :  { %521 = vsyncpa [#allocation6], 1 }
 0x26b   :  { %522 = vsyncpa [#allocation4], 1 }

</bundles_post_ra>
